<compile_context>
chip_gen: v6e
topology: v6e:2x2x1
jax: 0.10.0
libtpu: 0.0.40
codegen_flags: <defaults>
</compile_context>

<pallas_src>
import jax
import jax.numpy as jnp
from jax.experimental import pallas as pl
from jax.experimental.pallas import tpu as pltpu


def _round_up(n, m):
    return ((n + m - 1) // m) * m


# ---------------------------------------------------------------------------
# Kernel
# ---------------------------------------------------------------------------
def simplenet_kernel(x_ref, w1_ref, b1_ref, w2_ref, b2_ref, o_ref, acc_ref):
    h_idx = pl.program_id(1)

    @pl.when(h_idx == 0)
    def _():
        acc_ref[...] = jnp.zeros_like(acc_ref)

    # fc1 partial product on the MXU (bf16 inputs, f32 accumulation).
    h = jnp.dot(x_ref[...].astype(jnp.bfloat16), w1_ref[...],
                preferred_element_type=jnp.float32)
    # Bias add + ReLU in f32 on the VPU (exact under hidden-dim tiling).
    h = jnp.maximum(h + b1_ref[...], 0.0)
    # fc2 partial product, accumulated into the f32 VMEM scratch.
    acc_ref[...] += jnp.dot(h.astype(jnp.bfloat16), w2_ref[...],
                            preferred_element_type=jnp.float32)

    @pl.when(h_idx == pl.num_programs(1) - 1)
    def _():
        o_ref[...] = (acc_ref[...] + b2_ref[...]).astype(o_ref.dtype)


# ---------------------------------------------------------------------------
# Host-side setup
# ---------------------------------------------------------------------------
def prepare_params(w1, b1, w2, b2):
    """One-time parameter prep (call at init, NOT per forward call)."""
    # TODO(synk): optionally store fp8 weights here for the v7x fp8 MXU path.
    return (w1.astype(jnp.bfloat16),
            jnp.asarray(b1, jnp.float32).reshape(1, -1),
            w2.astype(jnp.bfloat16),
            jnp.asarray(b2, jnp.float32).reshape(1, -1))


# VMEM budget used to decide when to stream the hidden dim instead of keeping
# both weight matrices resident (conservative for v7x's 64 MiB per TC).
_WEIGHT_VMEM_BUDGET = 40 * 1024 * 1024


def _choose_tile_h(d_in, hidden, d_out, budget_bytes):
    """Largest hidden-dim tile: full hidden if resident weights fit the budget,
    otherwise the largest 128-multiple divisor whose (double-buffered) slices
    fit."""
    resident_bytes = 2 * (d_in * hidden + hidden * d_out) + 4 * (hidden + d_out)
    if resident_bytes <= budget_bytes or hidden % 128 != 0:
        # Fits (or hidden cannot be 128-tiled): keep everything resident.
        # TODO(synk): for huge hidden dims that are not multiples of 128,
        # pre-pad the hidden dim once in prepare_params so this path can tile.
        return hidden
    t = hidden
    while t > 128:
        if hidden % t == 0 and t % 128 == 0:
            slice_bytes = 2 * (2 * (d_in * t + t * d_out) + 4 * t) + 4 * d_out
            if slice_bytes <= budget_bytes:
                return t
        t -= 128
    return 128


def simplenet_forward(x, w1p, b1p, w2p, b2p, *, tile_b=256,
                      out_dtype=jnp.float32,
                      weight_vmem_budget=_WEIGHT_VMEM_BUDGET):
    """y = relu(x @ w1 + b1) @ w2 + b2  (params from prepare_params)."""
    B, D_in = x.shape
    D_in_w, H = w1p.shape
    H_w, D_out = w2p.shape
    assert D_in == D_in_w and H == H_w

    # Batch tile: sublane-aligned, never larger than the batch, and split so
    # the "parallel" batch axis has >=2 steps when possible (v7x has 2 TCs).
    tile_b = max(8, _round_up(min(tile_b, B), 8))
    if pl.cdiv(B, tile_b) < 2 and B > 8:
        tile_b = max(8, _round_up(pl.cdiv(B, 2), 8))

    tile_h = _choose_tile_h(D_in, H, D_out, weight_vmem_budget)
    num_h = H // tile_h          # tile_h always divides H exactly
    resident = num_h == 1
    w_mode = pl.Buffered(1) if resident else None   # single-buffer resident wts

    grid = (pl.cdiv(B, tile_b), num_h)

    # VMEM sizing: weights (1 buf resident / 2 bufs streamed), double-buffered
    # x / out tiles, f32 accumulator, then 2x slack.
    wbuf = 1 if resident else 2
    x_isz = jnp.dtype(x.dtype).itemsize
    o_isz = jnp.dtype(out_dtype).itemsize
    vmem_bytes = (wbuf * (2 * D_in * tile_h + 2 * tile_h * D_out + 4 * tile_h)
                  + 4 * D_out
                  + 2 * x_isz * tile_b * D_in
                  + 2 * o_isz * tile_b * D_out
                  + 4 * tile_b * D_out)
    vmem_limit = int(min(96 * 2**20, max(32 * 2**20, 2 * vmem_bytes)))

    flops = 2 * B * D_in * H + 2 * B * H * D_out
    bytes_accessed = int(x.size * x_isz + w1p.size * 2 + w2p.size * 2
                         + b1p.size * 4 + b2p.size * 4 + B * D_out * o_isz)

    return pl.pallas_call(
        simplenet_kernel,
        out_shape=jax.ShapeDtypeStruct((B, D_out), out_dtype),
        grid_spec=pltpu.PrefetchScalarGridSpec(
            num_scalar_prefetch=0,
            grid=grid,
            in_specs=[
                # x: one batch tile per step, unchanged across the hidden axis.
                pl.BlockSpec((tile_b, D_in), lambda b, h: (b, 0)),
                # w1 / b1 / w2: VMEM-resident (Buffered(1)) when num_h == 1,
                # otherwise streamed hidden-dim slices (default buffering).
                pl.BlockSpec((D_in, tile_h), lambda b, h: (0, h),
                             pipeline_mode=w_mode),
                pl.BlockSpec((1, tile_h), lambda b, h: (0, h),
                             pipeline_mode=w_mode),
                pl.BlockSpec((tile_h, D_out), lambda b, h: (h, 0),
                             pipeline_mode=w_mode),
                # b2: always resident.
                pl.BlockSpec((1, D_out), lambda b, h: (0, 0),
                             pipeline_mode=pl.Buffered(1)),
            ],
            out_specs=pl.BlockSpec((tile_b, D_out), lambda b, h: (b, 0)),
            scratch_shapes=[pltpu.VMEM((tile_b, D_out), jnp.float32)],
        ),
        compiler_params=pltpu.CompilerParams(
            dimension_semantics=("parallel", "arbitrary"),
            vmem_limit_bytes=vmem_limit,
        ),
        cost_estimate=pl.CostEstimate(
            flops=flops, transcendentals=0, bytes_accessed=bytes_accessed),
    )(x, w1p, b1p, w2p, b2p)


# ---------------------------------------------------------------------------
# Init / reference / test
# ---------------------------------------------------------------------------
def init_params(key, input_dim, hidden_dim, output_dim):
    # Deterministic init mimicking torch.nn.Linear's U(-1/sqrt(fan_in), ...).
    k1, k2, k3, k4 = jax.random.split(key, 4)
    lim1 = 1.0 / jnp.sqrt(jnp.float32(input_dim))
    lim2 = 1.0 / jnp.sqrt(jnp.float32(hidden_dim))
    # Stored already transposed: [in, out] (PyTorch stores [out, in]).
    w1 = jax.random.uniform(k1, (input_dim, hidden_dim), jnp.float32, -lim1, lim1)
    b1 = jax.random.uniform(k2, (1, hidden_dim), jnp.float32, -lim1, lim1)
    w2 = jax.random.uniform(k3, (hidden_dim, output_dim), jnp.float32, -lim2, lim2)
    b2 = jax.random.uniform(k4, (1, output_dim), jnp.float32, -lim2, lim2)
    return w1, b1, w2, b2


def reference_forward(x, w1, b1, w2, b2):
    # Plain-JAX reference replicating the kernel's bf16-in / f32-acc math.
    bf = lambda a: a.astype(jnp.bfloat16)
    h = jnp.dot(bf(x), bf(w1), preferred_element_type=jnp.float32) + b1
    h = jnp.maximum(h, 0.0)
    return jnp.dot(bf(h), bf(w2), preferred_element_type=jnp.float32) + b2


if __name__ == "__main__":
    key = jax.random.PRNGKey(0)
    kx, kp, kx2, kp2 = jax.random.split(key, 4)

    # Case 1: demo shapes -- weights resident, single small batch tile.
    batch, input_dim, hidden_dim, output_dim = 8, 32, 64, 16
    x = jax.random.normal(kx, (batch, input_dim), jnp.float32)
    w1, b1, w2, b2 = init_params(kp, input_dim, hidden_dim, output_dim)
    params = prepare_params(w1, b1, w2, b2)      # one-time prep, not per call

    out = jax.block_until_ready(simplenet_forward(x, *params))
    ref = reference_forward(x, w1, b1, w2, b2)
    assert out.shape == (batch, output_dim)
    assert jnp.allclose(out, ref, atol=2e-3, rtol=2e-3), (
        float(jnp.max(jnp.abs(out - ref))))

    # Case 2: ragged batch (2 "parallel" tiles, clipped last block) plus a
    # forced tiny VMEM budget to exercise the hidden-dim streaming/accumulator
    # path used when weights don't fit in VMEM.
    batch2, hidden2 = 24, 256
    x2 = jax.random.normal(kx2, (batch2, input_dim), jnp.float32)
    w1b, b1b, w2b, b2b = init_params(kp2, input_dim, hidden2, output_dim)
    params2 = prepare_params(w1b, b1b, w2b, b2b)
    out2 = jax.block_until_ready(
        simplenet_forward(x2, *params2, weight_vmem_budget=1024))
    ref2 = reference_forward(x2, w1b, b1b, w2b, b2b)
    assert out2.shape == (batch2, output_dim)
    assert jnp.allclose(out2, ref2, atol=2e-3, rtol=2e-3), (
        float(jnp.max(jnp.abs(out2 - ref2))))

    print("KERNEL_OK")
</pallas_src>

<mosaic_0001>
module attributes {stable_mosaic.version = 11 : i64} {
  func.func @simplenet_kernel(%arg0: i32, %arg1: i32, %arg2: memref<8x32xf32, #tpu.memory_space<vmem>>, %arg3: memref<32x64xbf16, #tpu.memory_space<vmem>>, %arg4: memref<1x64xf32, #tpu.memory_space<vmem>>, %arg5: memref<64x16xbf16, #tpu.memory_space<vmem>>, %arg6: memref<1x16xf32, #tpu.memory_space<vmem>>, %arg7: memref<8x16xf32, #tpu.memory_space<vmem>>, %arg8: memref<8x16xf32, #tpu.memory_space<vmem>>) attributes {dimension_semantics = [#tpu.dimension_semantics<parallel>, #tpu.dimension_semantics<arbitrary>], iteration_bounds = array<i64: 1, 1>, scalar_prefetch = 0 : i64, scratch_operands = 1 : i64, tpu.core_type = #tpu.core_type<tc>, window_params = [{transform_indices = @transform_0, window_bounds = array<i64: 8, 32>}, {pipeline_mode = #tpu.pipeline_mode<synchronous>, transform_indices = @transform_1, window_bounds = array<i64: 32, 64>}, {pipeline_mode = #tpu.pipeline_mode<synchronous>, transform_indices = @transform_2, window_bounds = array<i64: 1, 64>}, {pipeline_mode = #tpu.pipeline_mode<synchronous>, transform_indices = @transform_3, window_bounds = array<i64: 64, 16>}, {pipeline_mode = #tpu.pipeline_mode<synchronous>, transform_indices = @transform_4, window_bounds = array<i64: 1, 16>}, {transform_indices = @transform_5, window_bounds = array<i64: 8, 16>}]} {
    %c0_i32 = arith.constant 0 : i32
    %0 = arith.cmpi eq, %arg1, %c0_i32 : i32
    %1 = arith.extui %0 : i1 to i32
    %c0_i32_0 = arith.constant 0 : i32
    %2 = arith.cmpi ne, %1, %c0_i32_0 : i32
    scf.if %2 {
      %cst_16 = arith.constant 0.000000e+00 : f32
      %21 = vector.broadcast %cst_16 : f32 to vector<8x16xf32>
      %c0_17 = arith.constant 0 : index
      %c0_18 = arith.constant 0 : index
      %22 = vector.load %arg8[%c0_17, %c0_18] : memref<8x16xf32, #tpu.memory_space<vmem>>, vector<8x16xf32>
      tpu.vector_store %arg8[%c0_17, %c0_18], %21 {strides = array<i32>} : memref<8x16xf32, #tpu.memory_space<vmem>>, vector<8x16xf32>,
    } else {
    }
    %c0 = arith.constant 0 : index
    %c0_1 = arith.constant 0 : index
    %3 = vector.load %arg2[%c0, %c0_1] : memref<8x32xf32, #tpu.memory_space<vmem>>, vector<8x32xf32>
    %4 = arith.truncf %3 : vector<8x32xf32> to vector<8x32xbf16>
    %c0_2 = arith.constant 0 : index
    %c0_3 = arith.constant 0 : index
    %5 = vector.load %arg3[%c0_2, %c0_3] : memref<32x64xbf16, #tpu.memory_space<vmem>>, vector<32x64xbf16>
    %cst = arith.constant dense<0.000000e+00> : vector<8x64xf32>
    %6 = tpu.matmul %4, %5, %cst {dimension_numbers = #tpu.dot_dimension_numbers<[1], [0], [0], [1], [0, 0, 1, 1], [], []>} : vector<8x32xbf16>, vector<32x64xbf16>, vector<8x64xf32> -> vector<8x64xf32>
    %c0_4 = arith.constant 0 : index
    %c0_5 = arith.constant 0 : index
    %7 = vector.load %arg4[%c0_4, %c0_5] : memref<1x64xf32, #tpu.memory_space<vmem>>, vector<1x64xf32>
    %8 = vector.broadcast %7 : vector<1x64xf32> to vector<8x64xf32>
    %9 = arith.addf %6, %8 : vector<8x64xf32>
    %cst_6 = arith.constant 0.000000e+00 : f32
    %10 = vector.broadcast %cst_6 : f32 to vector<8x64xf32>
    %11 = arith.maximumf %9, %10 : vector<8x64xf32>
    %c0_7 = arith.constant 0 : index
    %c0_8 = arith.constant 0 : index
    %12 = vector.load %arg8[%c0_7, %c0_8] : memref<8x16xf32, #tpu.memory_space<vmem>>, vector<8x16xf32>
    %13 = arith.truncf %11 : vector<8x64xf32> to vector<8x64xbf16>
    %c0_9 = arith.constant 0 : index
    %c0_10 = arith.constant 0 : index
    %14 = vector.load %arg5[%c0_9, %c0_10] : memref<64x16xbf16, #tpu.memory_space<vmem>>, vector<64x16xbf16>
    %cst_11 = arith.constant dense<0.000000e+00> : vector<8x16xf32>
    %15 = tpu.matmul %13, %14, %cst_11 {dimension_numbers = #tpu.dot_dimension_numbers<[1], [0], [0], [1], [0, 0, 1, 1], [], []>} : vector<8x64xbf16>, vector<64x16xbf16>, vector<8x16xf32> -> vector<8x16xf32>
    %16 = arith.addf %12, %15 : vector<8x16xf32>
    %c0_12 = arith.constant 0 : index
    %c0_13 = arith.constant 0 : index
    %17 = vector.load %arg8[%c0_12, %c0_13] : memref<8x16xf32, #tpu.memory_space<vmem>>, vector<8x16xf32>
    tpu.vector_store %arg8[%c0_12, %c0_13], %16 {strides = array<i32>} : memref<8x16xf32, #tpu.memory_space<vmem>>, vector<8x16xf32>,
    %c0_i32_14 = arith.constant 0 : i32
    %18 = arith.cmpi eq, %arg1, %c0_i32_14 : i32
    %19 = arith.extui %18 : i1 to i32
    %c0_i32_15 = arith.constant 0 : i32
    %20 = arith.cmpi ne, %19, %c0_i32_15 : i32
    scf.if %20 {
      %c0_16 = arith.constant 0 : index
      %c0_17 = arith.constant 0 : index
      %21 = vector.load %arg8[%c0_16, %c0_17] : memref<8x16xf32, #tpu.memory_space<vmem>>, vector<8x16xf32>
      %c0_18 = arith.constant 0 : index
      %c0_19 = arith.constant 0 : index
      %22 = vector.load %arg6[%c0_18, %c0_19] : memref<1x16xf32, #tpu.memory_space<vmem>>, vector<1x16xf32>
      %23 = vector.broadcast %22 : vector<1x16xf32> to vector<8x16xf32>
      %24 = arith.addf %21, %23 : vector<8x16xf32>
      %c0_20 = arith.constant 0 : index
      %c0_21 = arith.constant 0 : index
      %25 = vector.load %arg7[%c0_20, %c0_21] : memref<8x16xf32, #tpu.memory_space<vmem>>, vector<8x16xf32>
      tpu.vector_store %arg7[%c0_20, %c0_21], %24 {strides = array<i32>} : memref<8x16xf32, #tpu.memory_space<vmem>>, vector<8x16xf32>,
    } else {
    }
    return
  }
  func.func @transform_0(%arg0: i32, %arg1: i32) -> (i32, i32) {
    %c0_i32 = arith.constant 0 : i32
    %c0_i32_0 = arith.constant 0 : i32
    return %arg0, %c0_i32 : i32, i32
  }
  func.func @transform_1(%arg0: i32, %arg1: i32) -> (i32, i32) {
    %c0_i32 = arith.constant 0 : i32
    %c0_i32_0 = arith.constant 0 : i32
    return %c0_i32, %arg1 : i32, i32
  }
  func.func @transform_2(%arg0: i32, %arg1: i32) -> (i32, i32) {
    %c0_i32 = arith.constant 0 : i32
    %c0_i32_0 = arith.constant 0 : i32
    return %c0_i32, %arg1 : i32, i32
  }
  func.func @transform_3(%arg0: i32, %arg1: i32) -> (i32, i32) {
    %c0_i32 = arith.constant 0 : i32
    %c0_i32_0 = arith.constant 0 : i32
    return %arg1, %c0_i32 : i32, i32
  }
  func.func @transform_4(%arg0: i32, %arg1: i32) -> (i32, i32) {
    %c0_i32 = arith.constant 0 : i32
    %c0_i32_0 = arith.constant 0 : i32
    %c0_i32_1 = arith.constant 0 : i32
    return %c0_i32, %c0_i32_0 : i32, i32
  }
  func.func @transform_5(%arg0: i32, %arg1: i32) -> (i32, i32) {
    %c0_i32 = arith.constant 0 : i32
    %c0_i32_0 = arith.constant 0 : i32
    return %arg0, %c0_i32 : i32, i32
  }
}

</mosaic_0001>

<bundles_post_ra>
// kernel: tpu_custom_call.1
= control target key start
LH: loop header
LB: loop body
LE: loop exit
PB: predicated region body
PF: predicated region fallthrough
CT: control target
= control target key end

     0   :  { %v275_v1 = vmov 0.0   ;;  %vm276_vm0 = vmmov 0   ;;  %vm53_vm1 = vcmask 261120   ;;  %s341_s0 = inlined_call_operand.vmem [shape: f32[8,32], index: 0, kind: input, shape index: {}]   ;;  %s342_s1 = inlined_call_operand.vmem [shape: bf16[32,64], index: 1, kind: input, shape index: {}]   ;;  %s343_s2 = inlined_call_operand.vmem [shape: f32[1,64], index: 2, kind: input, shape index: {}]   ;;  %s344_s3 = inlined_call_operand.vmem [shape: bf16[64,16], index: 3, kind: input, shape index: {}]   ;;  %s345_s4 = inlined_call_operand.vmem [shape: f32[1,16], index: 4, kind: input, shape index: {}]   ;;  %s346_s5 = inlined_call_operand.hbm [shape: f32[8,16], index: 5, kind: output, shape index: {}]  }
   0x1   :  { %v247_v0 = vld [vmem:[%s342_s1 + $0x8] sm:$0xff]   ;;  %224 = vmatprep.subr.bf16.mxu0 %v275_v1  ;;  %v248_v2 = vld [vmem:[%s342_s1] sm:$0xff]   ;;  %232 = vmatprep.subr.bf16.mxu1 %v275_v1  ;;  %v249_v4 = vld [vmem:[%s344_s3 + $0x18] sm:$0xff]  }
   0x2   :  { %225 = vmatpush3.bf16.msra.mxu0 %v247_v0  ;;  %228 = vmatprep.mubr.msk.bf16.mxu0 %vm276_vm0, %v275_v1  ;;  %v28_v3 = vld [vmem:[%s341_s0] sm:$0xff]  ;;  %v250_v5 = vld [vmem:[%s344_s3 + $0x10] sm:$0xff]  }
   0x3   :  { %226 = vmatprep.subr.bf16.mxu0 %v275_v1  ;;  %240 = vmatprep.mubr.msk.bf16.mxu1 %vm276_vm0, %v275_v1  ;;  %v29_v6 = vpack.c.bf16 %v28_v3, %v28_v3 }
   0x4   :  { %233 = vmatpush3.bf16.msra.mxu1 %v249_v4 }
   0x5   :  { %234 = vmatprep.subr.bf16.mxu1 %v275_v1 }
   0x6   :  { %227 = vmatpush3.bf16.msra.mxu0 %v248_v2 }
   0x7   :  { %10 = vsyncpa [#allocation4], 0  ;;  %v251_v7 = vld [vmem:[%s344_s3 + $0x8] sm:$0xff]   ;;  %v252_v8 = vld [vmem:[%s344_s3] sm:$0xff]   ;;  %vm26_vm2 = vcmask 130048   ;;  %vm132_vm3 = vcmask 523264  }
   0x8   :  { %235 = vmatpush3.bf16.msra.mxu1 %v250_v5  ;;  %27 = vst.msk [vmem:[#allocation2] sm:$0xff] %vm26_vm2, %v275_v1  ;;  %v206_v9 = vld [vmem:[%s343_s2] ss:$0 sm:$0xff]  ;;  %s277_s2 = smov [#allocation3]  }
   0x9   :  { %229 = vmatmul.mubr.msk.bf16.vlgmr.msra.gmra.mxu0 %vm53_vm1, %v29_v6  ;;  %236 = vmatprep.subr.bf16.mxu1 %v275_v1  ;;  %v215_v23 = vld [vmem:[%s345_s4] ss:$0 sm:$0xff]  ;;  %s198_s8 = sshll.u32 %s277_s2, 4  ;;  %s199_s8 = int_to_ptr.vmem [resolvable:$true] %s198_s8 }
   0xa   :  { %s253_s9 = scalar_lea.vmem %s199_s8, 128  ;;  %p258_p1 = scmp.lt.s32.totalorder %s199_s8, %s199_s8 }
   0xb   :  { %p254_p0 = scmp.ne.s32.totalorder %s199_s8, %s253_s9  ;;  %p259_p2 = scmp.lt.s32.totalorder %s253_s9, %s253_s9 }
   0xc   :  { %237 = vmatpush3.bf16.msra.mxu1 %v251_v7 }
   0xd   :  { %238 = vmatprep.subr.bf16.mxu1 %v275_v1  ;;  %p260_p3 = por %p259_p2, %p258_p1 }
   0xf   :  { %v98_v17 = vld [vmem:[#allocation2] sm:$0xff]  ;;  %p261_p4 = pnand %p260_p3, %p254_p0 }
  0x10   :  { %239 = vmatpush3.bf16.msra.mxu1 %v252_v8 }
  0xc9   :  { %v91_v10 = vpop.f32.mrf.mxu0 }
  0xca   :  { %v92_v11 = vadd.f32 %v206_v9, %v91_v10 }
  0xcb   :  { %v230_v12 = vpop.f32.mrf.mxu0 }
  0xcc   :  { %v97_v13 = vmax.f32 %v92_v11, 0.0 }
  0xcd   :  { %v94_v14 = vpop.f32.mrf.mxu0 }
  0xce   :  { %v99_v15 = vpack.c.bf16 %v97_v13, %v97_v13 }
  0xcf   :  { %v231_v16 = vpop.f32.mrf.mxu0 }
  0xd0   :  { %241 = vmatmul.mubr.msk.bf16.vlgmr.msra.gmra.mxu1 %vm132_vm3, %v99_v15 }
 0x190   :  { %v170_v18 = vpop.f32.mrf.mxu1 }
 0x191   :  { %v176_v19 = vadd.f32 %v170_v18, %v98_v17 }
 0x192   :  { %v242_v20 = vpop.f32.mrf.mxu1 }
 0x193   :  { %178 = vst.msk [vmem:[#allocation2] sm:$0xff] %vm26_vm2, %v176_v19 }
 0x194   :  { %v173_v21 = vpop.f32.mrf.mxu1 }
 0x196   :  { %v243_v22 = vpop.f32.mrf.mxu1 }
 0x19a   :  { %v182_v24 = vld [vmem:[#allocation2] sm:$0xff] }
 0x19b   :  { %v190_v25 = vadd.f32 %v215_v23, %v182_v24 }
 0x19d   :  { %191 = vst.msk [vmem:[#allocation3] sm:$0xff] %vm26_vm2, %v190_v25 }
 0x19e   :  { %264 = shalt.err (!%p261_p4)
}
 0x19f   :  { %201 = dma.vmem_to_hbm [thread:$0]  %s199_s8, 128, %s346_s5, [#allocation4]  }
 0x1a0   :  { %273 = dma.done.wait [#allocation4], 128  }
 0x1a1   :  { %274 = vsyncadd [#allocation4], 4294967168 }
 0x1a2   :  { %205 = vsyncpa [#allocation4], 1 }

</bundles_post_ra>
